<compile_context>
chip_gen: v7x
topology: tpu7x:2x2x1
jax: 0.10.0
libtpu: 0.0.40
codegen_flags: <defaults>
</compile_context>

<pallas_src>
import functools

import jax
import jax.numpy as jnp
from jax.experimental import pallas as pl
from jax.experimental.pallas import tpu as pltpu

LANE = 128   # lane width (last-dim alignment)


def _round_up(x, m):
    return ((x + m - 1) // m) * m


def _nbytes(a):
    return a.size * a.dtype.itemsize


# ---------------------------------------------------------------------------
# Fused MLP kernel: the whole [Linear -> ReLU]*(L-1) -> Linear chain in one
# kernel body. The running activation never leaves vregs/VMEM.
# ---------------------------------------------------------------------------
def _fused_mlp_kernel(x_ref, w_first_ref, b_first_ref, w_hid_ref, b_hid_ref,
                      w_last_ref, b_last_ref, o_ref, *, num_hidden,
                      compute_dtype):
    # x_ref:       [tm, P_in]                  activation tile (batch rows)
    # w_first_ref: [P_in, P_h]   (compute_dtype, e.g. bf16)
    # b_first_ref: [1, P_h]      (f32)
    # w_hid_ref:   [max(num_hidden,1), P_h, P_h]
    # b_hid_ref:   [max(num_hidden,1), 1, P_h]
    # w_last_ref:  [P_h, P_out]
    # b_last_ref:  [1, P_out]
    # o_ref:       [tm, P_out]
    h = x_ref[...].astype(compute_dtype)

    # Layer 0: Linear + ReLU  (Dropout == identity in eval mode)
    h = jnp.dot(h, w_first_ref[...], preferred_element_type=jnp.float32)
    h = jnp.maximum(h + b_first_ref[...], 0.0)

    # Hidden layers: Linear + ReLU (static unroll, num_hidden is small)
    for layer in range(num_hidden):
        h = jnp.dot(h.astype(compute_dtype), w_hid_ref[layer],
                    preferred_element_type=jnp.float32)
        h = jnp.maximum(h + b_hid_ref[layer], 0.0)

    # Final layer: Linear only (no ReLU / Dropout)
    h = jnp.dot(h.astype(compute_dtype), w_last_ref[...],
                preferred_element_type=jnp.float32)
    h = h + b_last_ref[...]

    o_ref[...] = h.astype(o_ref.dtype)


# ---------------------------------------------------------------------------
# Parameter construction / packing
# ---------------------------------------------------------------------------
def init_fcblock_params(key, in_features, out_features, num_hidden_layers,
                        hidden_features, dtype=jnp.float32):
    """List of (W[in,out], b[out]) matching the PyTorch layer stack."""
    dims = ([(in_features, hidden_features)]
            + [(hidden_features, hidden_features)] * num_hidden_layers
            + [(hidden_features, out_features)])
    params = []
    for fan_in, fan_out in dims:
        key, kw, kb = jax.random.split(key, 3)
        bound = 1.0 / (fan_in ** 0.5)   # PyTorch nn.Linear default init
        w = jax.random.uniform(kw, (fan_in, fan_out), dtype,
                               minval=-bound, maxval=bound)
        b = jax.random.uniform(kb, (fan_out,), dtype,
                               minval=-bound, maxval=bound)
        params.append((w, b))
    return params


def pack_fcblock_params(params, compute_dtype=jnp.bfloat16,
                        bias_dtype=jnp.float32):
    """One-time packing with PER-LAYER padding (each dim rounded to 128)."""
    num_layers = len(params)
    assert num_layers >= 2, "FCBlock always has at least first + last Linear"
    num_hidden = num_layers - 2

    f_in = params[0][0].shape[0]
    hidden = params[0][0].shape[1]
    f_out = params[-1][0].shape[1]

    p_in = _round_up(f_in, LANE)
    p_h = _round_up(hidden, LANE)
    p_out = _round_up(f_out, LANE)

    w0, b0 = params[0]
    w_first = (jnp.zeros((p_in, p_h), compute_dtype)
               .at[:f_in, :hidden].set(w0.astype(compute_dtype)))
    b_first = (jnp.zeros((1, p_h), bias_dtype)
               .at[0, :hidden].set(b0.astype(bias_dtype)))

    nh_blocks = max(num_hidden, 1)            # keep a non-empty dummy if L==2
    w_hid = jnp.zeros((nh_blocks, p_h, p_h), compute_dtype)
    b_hid = jnp.zeros((nh_blocks, 1, p_h), bias_dtype)
    for layer in range(num_hidden):
        w, b = params[1 + layer]
        w_hid = w_hid.at[layer, :hidden, :hidden].set(w.astype(compute_dtype))
        b_hid = b_hid.at[layer, 0, :hidden].set(b.astype(bias_dtype))

    wl, bl = params[-1]
    w_last = (jnp.zeros((p_h, p_out), compute_dtype)
              .at[:hidden, :f_out].set(wl.astype(compute_dtype)))
    b_last = (jnp.zeros((1, p_out), bias_dtype)
              .at[0, :f_out].set(bl.astype(bias_dtype)))

    return {
        "w_first": w_first, "b_first": b_first,
        "w_hid": w_hid, "b_hid": b_hid,
        "w_last": w_last, "b_last": b_last,
        "num_hidden": num_hidden,
        "compute_dtype": compute_dtype,
        "f_in": f_in, "f_out": f_out,
        "p_in": p_in, "p_h": p_h, "p_out": p_out,
    }


# ---------------------------------------------------------------------------
# Forward pass
# ---------------------------------------------------------------------------
def fcblock_forward(packed, x, *, block_rows=256):
    """x: [N, in_features] -> [N, out_features] via one fused Pallas kernel."""
    n, f_in = x.shape
    assert f_in == packed["f_in"], (f_in, packed["f_in"])
    p_in, p_h, p_out = packed["p_in"], packed["p_h"], packed["p_out"]
    f_out = packed["f_out"]
    num_hidden = packed["num_hidden"]
    nh_blocks = packed["w_hid"].shape[0]

    # Batch tiling: rows aligned to the native sublane tile of x.dtype
    # (8 rows f32, 16 bf16, 32 int8/fp8).
    itemsize = jnp.dtype(x.dtype).itemsize
    sublane = max(8, 32 // itemsize)
    tm = min(_round_up(block_rows, sublane), _round_up(n, sublane))
    n_pad = _round_up(n, tm)
    # v7x has 2 TensorCores: make sure there are >= 2 parallel batch tiles
    # when the batch is big enough to split.
    if n_pad // tm == 1 and tm > sublane:
        tm = _round_up(tm // 2, sublane)
        n_pad = _round_up(n, tm)

    # Narrow, lane-dense input slab: only round_up(f_in, 128) lanes.
    x_pad = jnp.zeros((n_pad, p_in), x.dtype).at[:n, :f_in].set(x)

    kernel = functools.partial(_fused_mlp_kernel, num_hidden=num_hidden,
                               compute_dtype=packed["compute_dtype"])

    # VMEM budget (weights single-buffered + double-buffered x/out tiles
    # + f32 intermediate activations) with headroom, clamped for v7x (64 MiB).
    w_bytes = (_nbytes(packed["w_first"]) + _nbytes(packed["w_hid"])
               + _nbytes(packed["w_last"]))
    b_bytes = (_nbytes(packed["b_first"]) + _nbytes(packed["b_hid"])
               + _nbytes(packed["b_last"]))
    tile_bytes = 2 * tm * (p_in + p_out) * itemsize
    act_bytes = 2 * tm * max(p_in, p_h, p_out) * 4
    needed = w_bytes + b_bytes + tile_bytes + act_bytes
    vmem_limit = int(min(max(2 * needed, 32 * 1024 * 1024), 64 * 1024 * 1024))

    flops = 2 * n_pad * (p_in * p_h + num_hidden * p_h * p_h + p_h * p_out)
    bytes_accessed = (_nbytes(x_pad) + n_pad * p_out * itemsize
                      + w_bytes + b_bytes)
    cost = pl.CostEstimate(flops=flops, transcendentals=0,
                           bytes_accessed=bytes_accessed)

    def _call(single_buffer_weights):
        def const_spec(shape):
            idx = lambda i, nd=len(shape): (0,) * nd
            if single_buffer_weights:
                # Constant index_map -> never re-fetched; one buffer suffices.
                return pl.BlockSpec(shape, idx, pipeline_mode=pl.Buffered(1))
            return pl.BlockSpec(shape, idx)

        return pl.pallas_call(
            kernel,
            out_shape=jax.ShapeDtypeStruct((n_pad, p_out), x.dtype),
            grid=(n_pad // tm,),
            in_specs=[
                # activation tile marches over the batch
                pl.BlockSpec((tm, p_in), lambda i: (i, 0)),
                # resident (constant index_map) weights / biases
                const_spec((p_in, p_h)),
                const_spec((1, p_h)),
                const_spec((nh_blocks, p_h, p_h)),
                const_spec((nh_blocks, 1, p_h)),
                const_spec((p_h, p_out)),
                const_spec((1, p_out)),
            ],
            out_specs=pl.BlockSpec((tm, p_out), lambda i: (i, 0)),
            compiler_params=pltpu.CompilerParams(
                dimension_semantics=("parallel",),
                vmem_limit_bytes=vmem_limit),
            cost_estimate=cost,
        )(x_pad, packed["w_first"], packed["b_first"],
          packed["w_hid"], packed["b_hid"],
          packed["w_last"], packed["b_last"])

    try:
        out_pad = _call(single_buffer_weights=True)
    except Exception:
        # Fallback if this JAX build rejects pl.Buffered(1) for inputs.
        out_pad = _call(single_buffer_weights=False)

    return out_pad[:n, :f_out]


# ---------------------------------------------------------------------------
# Pure-JAX reference (mirrors the kernel's bf16-operand / f32-accum recipe)
# ---------------------------------------------------------------------------
def fcblock_reference(params, x, compute_dtype=jnp.bfloat16):
    h = x.astype(jnp.float32)
    for idx, (w, b) in enumerate(params):
        h = jnp.dot(h.astype(compute_dtype), w.astype(compute_dtype),
                    preferred_element_type=jnp.float32) + b.astype(jnp.float32)
        if idx != len(params) - 1:
            h = jnp.maximum(h, 0.0)
    return h


if __name__ == "__main__":
    # FCBlock(in=16, out=8, num_hidden_layers=2, hidden=32), batch of 8 points.
    in_features, out_features = 16, 8
    num_hidden_layers, hidden_features = 2, 32
    batch = 8

    key = jax.random.PRNGKey(0)
    key, kx = jax.random.split(key)
    x = jax.random.normal(kx, (batch, in_features), dtype=jnp.float32)

    params = init_fcblock_params(key, in_features, out_features,
                                 num_hidden_layers, hidden_features)
    packed = pack_fcblock_params(params)   # one-time packing (hoisted)

    out = fcblock_forward(packed, x)
    out = jax.block_until_ready(out)

    ref = fcblock_reference(params, x, compute_dtype=packed["compute_dtype"])
    assert out.shape == (batch, out_features), out.shape
    assert jnp.allclose(out, ref, atol=1e-2, rtol=1e-2), "mismatch vs reference"

    print("KERNEL_OK")
</pallas_src>

<mosaic_0001>
module attributes {stable_mosaic.version = 11 : i64} {
  func.func @_fused_mlp_kernel(%arg0: i32, %arg1: memref<8x128xf32, #tpu.memory_space<vmem>>, %arg2: memref<128x128xbf16, #tpu.memory_space<vmem>>, %arg3: memref<1x128xf32, #tpu.memory_space<vmem>>, %arg4: memref<2x128x128xbf16, #tpu.memory_space<vmem>>, %arg5: memref<2x1x128xf32, #tpu.memory_space<vmem>>, %arg6: memref<128x128xbf16, #tpu.memory_space<vmem>>, %arg7: memref<1x128xf32, #tpu.memory_space<vmem>>, %arg8: memref<8x128xf32, #tpu.memory_space<vmem>>) attributes {dimension_semantics = [#tpu.dimension_semantics<parallel>], iteration_bounds = array<i64: 1>, scalar_prefetch = 0 : i64, scratch_operands = 0 : i64, tpu.core_type = #tpu.core_type<tc>, window_params = [{transform_indices = @transform_0, window_bounds = array<i64: 8, 128>}, {pipeline_mode = #tpu.pipeline_mode<synchronous>, transform_indices = @transform_1, window_bounds = array<i64: 128, 128>}, {pipeline_mode = #tpu.pipeline_mode<synchronous>, transform_indices = @transform_2, window_bounds = array<i64: 1, 128>}, {pipeline_mode = #tpu.pipeline_mode<synchronous>, transform_indices = @transform_3, window_bounds = array<i64: 2, 128, 128>}, {pipeline_mode = #tpu.pipeline_mode<synchronous>, transform_indices = @transform_4, window_bounds = array<i64: 2, 1, 128>}, {pipeline_mode = #tpu.pipeline_mode<synchronous>, transform_indices = @transform_5, window_bounds = array<i64: 128, 128>}, {pipeline_mode = #tpu.pipeline_mode<synchronous>, transform_indices = @transform_6, window_bounds = array<i64: 1, 128>}, {transform_indices = @transform_7, window_bounds = array<i64: 8, 128>}]} {
    %c0 = arith.constant 0 : index
    %c0_0 = arith.constant 0 : index
    %0 = vector.load %arg1[%c0, %c0_0] : memref<8x128xf32, #tpu.memory_space<vmem>>, vector<8x128xf32>
    %1 = arith.truncf %0 : vector<8x128xf32> to vector<8x128xbf16>
    %c0_1 = arith.constant 0 : index
    %c0_2 = arith.constant 0 : index
    %2 = vector.load %arg2[%c0_1, %c0_2] : memref<128x128xbf16, #tpu.memory_space<vmem>>, vector<128x128xbf16>
    %cst = arith.constant dense<0.000000e+00> : vector<8x128xf32>
    %3 = tpu.matmul %1, %2, %cst {dimension_numbers = #tpu.dot_dimension_numbers<[1], [0], [0], [1], [0, 0, 1, 1], [], []>} : vector<8x128xbf16>, vector<128x128xbf16>, vector<8x128xf32> -> vector<8x128xf32>
    %c0_3 = arith.constant 0 : index
    %c0_4 = arith.constant 0 : index
    %4 = vector.load %arg3[%c0_3, %c0_4] : memref<1x128xf32, #tpu.memory_space<vmem>>, vector<1x128xf32>
    %5 = vector.broadcast %4 : vector<1x128xf32> to vector<8x128xf32>
    %6 = arith.addf %3, %5 : vector<8x128xf32>
    %cst_5 = arith.constant 0.000000e+00 : f32
    %7 = vector.broadcast %cst_5 : f32 to vector<8x128xf32>
    %8 = arith.maximumf %6, %7 : vector<8x128xf32>
    %9 = arith.truncf %8 : vector<8x128xf32> to vector<8x128xbf16>
    %c0_6 = arith.constant 0 : index
    %c0_7 = arith.constant 0 : index
    %c0_8 = arith.constant 0 : index
    %10 = vector.load %arg4[%c0_6, %c0_7, %c0_8] : memref<2x128x128xbf16, #tpu.memory_space<vmem>>, vector<1x128x128xbf16>
    %11 = vector.shape_cast %10 : vector<1x128x128xbf16> to vector<128x128xbf16>
    %cst_9 = arith.constant dense<0.000000e+00> : vector<8x128xf32>
    %12 = tpu.matmul %9, %11, %cst_9 {dimension_numbers = #tpu.dot_dimension_numbers<[1], [0], [0], [1], [0, 0, 1, 1], [], []>} : vector<8x128xbf16>, vector<128x128xbf16>, vector<8x128xf32> -> vector<8x128xf32>
    %c0_10 = arith.constant 0 : index
    %c0_11 = arith.constant 0 : index
    %c0_12 = arith.constant 0 : index
    %13 = vector.load %arg5[%c0_10, %c0_11, %c0_12] : memref<2x1x128xf32, #tpu.memory_space<vmem>>, vector<1x1x128xf32>
    %14 = vector.shape_cast %13 : vector<1x1x128xf32> to vector<1x128xf32>
    %15 = vector.broadcast %14 : vector<1x128xf32> to vector<8x128xf32>
    %16 = arith.addf %12, %15 : vector<8x128xf32>
    %cst_13 = arith.constant 0.000000e+00 : f32
    %17 = vector.broadcast %cst_13 : f32 to vector<8x128xf32>
    %18 = arith.maximumf %16, %17 : vector<8x128xf32>
    %19 = arith.truncf %18 : vector<8x128xf32> to vector<8x128xbf16>
    %c1 = arith.constant 1 : index
    %c0_14 = arith.constant 0 : index
    %c0_15 = arith.constant 0 : index
    %20 = vector.load %arg4[%c1, %c0_14, %c0_15] : memref<2x128x128xbf16, #tpu.memory_space<vmem>>, vector<1x128x128xbf16>
    %21 = vector.shape_cast %20 : vector<1x128x128xbf16> to vector<128x128xbf16>
    %cst_16 = arith.constant dense<0.000000e+00> : vector<8x128xf32>
    %22 = tpu.matmul %19, %21, %cst_16 {dimension_numbers = #tpu.dot_dimension_numbers<[1], [0], [0], [1], [0, 0, 1, 1], [], []>} : vector<8x128xbf16>, vector<128x128xbf16>, vector<8x128xf32> -> vector<8x128xf32>
    %c1_17 = arith.constant 1 : index
    %c0_18 = arith.constant 0 : index
    %c0_19 = arith.constant 0 : index
    %23 = vector.load %arg5[%c1_17, %c0_18, %c0_19] : memref<2x1x128xf32, #tpu.memory_space<vmem>>, vector<1x1x128xf32>
    %24 = vector.shape_cast %23 : vector<1x1x128xf32> to vector<1x128xf32>
    %25 = vector.broadcast %24 : vector<1x128xf32> to vector<8x128xf32>
    %26 = arith.addf %22, %25 : vector<8x128xf32>
    %cst_20 = arith.constant 0.000000e+00 : f32
    %27 = vector.broadcast %cst_20 : f32 to vector<8x128xf32>
    %28 = arith.maximumf %26, %27 : vector<8x128xf32>
    %29 = arith.truncf %28 : vector<8x128xf32> to vector<8x128xbf16>
    %c0_21 = arith.constant 0 : index
    %c0_22 = arith.constant 0 : index
    %30 = vector.load %arg6[%c0_21, %c0_22] : memref<128x128xbf16, #tpu.memory_space<vmem>>, vector<128x128xbf16>
    %cst_23 = arith.constant dense<0.000000e+00> : vector<8x128xf32>
    %31 = tpu.matmul %29, %30, %cst_23 {dimension_numbers = #tpu.dot_dimension_numbers<[1], [0], [0], [1], [0, 0, 1, 1], [], []>} : vector<8x128xbf16>, vector<128x128xbf16>, vector<8x128xf32> -> vector<8x128xf32>
    %c0_24 = arith.constant 0 : index
    %c0_25 = arith.constant 0 : index
    %32 = vector.load %arg7[%c0_24, %c0_25] : memref<1x128xf32, #tpu.memory_space<vmem>>, vector<1x128xf32>
    %33 = vector.broadcast %32 : vector<1x128xf32> to vector<8x128xf32>
    %34 = arith.addf %31, %33 : vector<8x128xf32>
    %c0_26 = arith.constant 0 : index
    %c0_27 = arith.constant 0 : index
    %35 = vector.load %arg8[%c0_26, %c0_27] : memref<8x128xf32, #tpu.memory_space<vmem>>, vector<8x128xf32>
    tpu.vector_store %arg8[%c0_26, %c0_27], %34 {strides = array<i32>} : memref<8x128xf32, #tpu.memory_space<vmem>>, vector<8x128xf32>,
    return
  }
  func.func @transform_0(%arg0: i32) -> (i32, i32) {
    %c0_i32 = arith.constant 0 : i32
    %c0_i32_0 = arith.constant 0 : i32
    return %arg0, %c0_i32 : i32, i32
  }
  func.func @transform_1(%arg0: i32) -> (i32, i32) {
    %c0_i32 = arith.constant 0 : i32
    %c0_i32_0 = arith.constant 0 : i32
    %c0_i32_1 = arith.constant 0 : i32
    return %c0_i32, %c0_i32_0 : i32, i32
  }
  func.func @transform_2(%arg0: i32) -> (i32, i32) {
    %c0_i32 = arith.constant 0 : i32
    %c0_i32_0 = arith.constant 0 : i32
    %c0_i32_1 = arith.constant 0 : i32
    return %c0_i32, %c0_i32_0 : i32, i32
  }
  func.func @transform_3(%arg0: i32) -> (i32, i32, i32) {
    %c0_i32 = arith.constant 0 : i32
    %c0_i32_0 = arith.constant 0 : i32
    %c0_i32_1 = arith.constant 0 : i32
    %c0_i32_2 = arith.constant 0 : i32
    return %c0_i32, %c0_i32_0, %c0_i32_1 : i32, i32, i32
  }
  func.func @transform_4(%arg0: i32) -> (i32, i32, i32) {
    %c0_i32 = arith.constant 0 : i32
    %c0_i32_0 = arith.constant 0 : i32
    %c0_i32_1 = arith.constant 0 : i32
    %c0_i32_2 = arith.constant 0 : i32
    return %c0_i32, %c0_i32_0, %c0_i32_1 : i32, i32, i32
  }
  func.func @transform_5(%arg0: i32) -> (i32, i32) {
    %c0_i32 = arith.constant 0 : i32
    %c0_i32_0 = arith.constant 0 : i32
    %c0_i32_1 = arith.constant 0 : i32
    return %c0_i32, %c0_i32_0 : i32, i32
  }
  func.func @transform_6(%arg0: i32) -> (i32, i32) {
    %c0_i32 = arith.constant 0 : i32
    %c0_i32_0 = arith.constant 0 : i32
    %c0_i32_1 = arith.constant 0 : i32
    return %c0_i32, %c0_i32_0 : i32, i32
  }
  func.func @transform_7(%arg0: i32) -> (i32, i32) {
    %c0_i32 = arith.constant 0 : i32
    %c0_i32_0 = arith.constant 0 : i32
    return %arg0, %c0_i32 : i32, i32
  }
}

module attributes {stable_mosaic.version = 11 : i64} {
  func.func @_fused_mlp_kernel(%arg0: i32, %arg1: memref<8x128xf32, #tpu.memory_space<vmem>>, %arg2: memref<128x128xbf16, #tpu.memory_space<vmem>>, %arg3: memref<1x128xf32, #tpu.memory_space<vmem>>, %arg4: memref<2x128x128xbf16, #tpu.memory_space<vmem>>, %arg5: memref<2x1x128xf32, #tpu.memory_space<vmem>>, %arg6: memref<128x128xbf16, #tpu.memory_space<vmem>>, %arg7: memref<1x128xf32, #tpu.memory_space<vmem>>, %arg8: memref<8x128xf32, #tpu.memory_space<vmem>>) attributes {dimension_semantics = [#tpu.dimension_semantics<parallel>], iteration_bounds = array<i64: 1>, scalar_prefetch = 0 : i64, scratch_operands = 0 : i64, tpu.core_type = #tpu.core_type<tc>, window_params = [{transform_indices = @transform_0, window_bounds = array<i64: 8, 128>}, {pipeline_mode = #tpu.pipeline_mode<synchronous>, transform_indices = @transform_1, window_bounds = array<i64: 128, 128>}, {pipeline_mode = #tpu.pipeline_mode<synchronous>, transform_indices = @transform_2, window_bounds = array<i64: 1, 128>}, {pipeline_mode = #tpu.pipeline_mode<synchronous>, transform_indices = @transform_3, window_bounds = array<i64: 2, 128, 128>}, {pipeline_mode = #tpu.pipeline_mode<synchronous>, transform_indices = @transform_4, window_bounds = array<i64: 2, 1, 128>}, {pipeline_mode = #tpu.pipeline_mode<synchronous>, transform_indices = @transform_5, window_bounds = array<i64: 128, 128>}, {pipeline_mode = #tpu.pipeline_mode<synchronous>, transform_indices = @transform_6, window_bounds = array<i64: 1, 128>}, {transform_indices = @transform_7, window_bounds = array<i64: 8, 128>}]} {
    %c0 = arith.constant 0 : index
    %c0_0 = arith.constant 0 : index
    %0 = vector.load %arg1[%c0, %c0_0] : memref<8x128xf32, #tpu.memory_space<vmem>>, vector<8x128xf32>
    %1 = arith.truncf %0 : vector<8x128xf32> to vector<8x128xbf16>
    %c0_1 = arith.constant 0 : index
    %c0_2 = arith.constant 0 : index
    %2 = vector.load %arg2[%c0_1, %c0_2] : memref<128x128xbf16, #tpu.memory_space<vmem>>, vector<128x128xbf16>
    %cst = arith.constant dense<0.000000e+00> : vector<8x128xf32>
    %3 = tpu.matmul %1, %2, %cst {dimension_numbers = #tpu.dot_dimension_numbers<[1], [0], [0], [1], [0, 0, 1, 1], [], []>} : vector<8x128xbf16>, vector<128x128xbf16>, vector<8x128xf32> -> vector<8x128xf32>
    %c0_3 = arith.constant 0 : index
    %c0_4 = arith.constant 0 : index
    %4 = vector.load %arg3[%c0_3, %c0_4] : memref<1x128xf32, #tpu.memory_space<vmem>>, vector<1x128xf32>
    %5 = vector.broadcast %4 : vector<1x128xf32> to vector<8x128xf32>
    %6 = arith.addf %3, %5 : vector<8x128xf32>
    %cst_5 = arith.constant 0.000000e+00 : f32
    %7 = vector.broadcast %cst_5 : f32 to vector<8x128xf32>
    %8 = arith.maximumf %6, %7 : vector<8x128xf32>
    %9 = arith.truncf %8 : vector<8x128xf32> to vector<8x128xbf16>
    %c0_6 = arith.constant 0 : index
    %c0_7 = arith.constant 0 : index
    %c0_8 = arith.constant 0 : index
    %10 = vector.load %arg4[%c0_6, %c0_7, %c0_8] : memref<2x128x128xbf16, #tpu.memory_space<vmem>>, vector<1x128x128xbf16>
    %11 = vector.shape_cast %10 : vector<1x128x128xbf16> to vector<128x128xbf16>
    %cst_9 = arith.constant dense<0.000000e+00> : vector<8x128xf32>
    %12 = tpu.matmul %9, %11, %cst_9 {dimension_numbers = #tpu.dot_dimension_numbers<[1], [0], [0], [1], [0, 0, 1, 1], [], []>} : vector<8x128xbf16>, vector<128x128xbf16>, vector<8x128xf32> -> vector<8x128xf32>
    %c0_10 = arith.constant 0 : index
    %c0_11 = arith.constant 0 : index
    %c0_12 = arith.constant 0 : index
    %13 = vector.load %arg5[%c0_10, %c0_11, %c0_12] : memref<2x1x128xf32, #tpu.memory_space<vmem>>, vector<1x1x128xf32>
    %14 = vector.shape_cast %13 : vector<1x1x128xf32> to vector<1x128xf32>
    %15 = vector.broadcast %14 : vector<1x128xf32> to vector<8x128xf32>
    %16 = arith.addf %12, %15 : vector<8x128xf32>
    %cst_13 = arith.constant 0.000000e+00 : f32
    %17 = vector.broadcast %cst_13 : f32 to vector<8x128xf32>
    %18 = arith.maximumf %16, %17 : vector<8x128xf32>
    %19 = arith.truncf %18 : vector<8x128xf32> to vector<8x128xbf16>
    %c1 = arith.constant 1 : index
    %c0_14 = arith.constant 0 : index
    %c0_15 = arith.constant 0 : index
    %20 = vector.load %arg4[%c1, %c0_14, %c0_15] : memref<2x128x128xbf16, #tpu.memory_space<vmem>>, vector<1x128x128xbf16>
    %21 = vector.shape_cast %20 : vector<1x128x128xbf16> to vector<128x128xbf16>
    %cst_16 = arith.constant dense<0.000000e+00> : vector<8x128xf32>
    %22 = tpu.matmul %19, %21, %cst_16 {dimension_numbers = #tpu.dot_dimension_numbers<[1], [0], [0], [1], [0, 0, 1, 1], [], []>} : vector<8x128xbf16>, vector<128x128xbf16>, vector<8x128xf32> -> vector<8x128xf32>
    %c1_17 = arith.constant 1 : index
    %c0_18 = arith.constant 0 : index
    %c0_19 = arith.constant 0 : index
    %23 = vector.load %arg5[%c1_17, %c0_18, %c0_19] : memref<2x1x128xf32, #tpu.memory_space<vmem>>, vector<1x1x128xf32>
    %24 = vector.shape_cast %23 : vector<1x1x128xf32> to vector<1x128xf32>
    %25 = vector.broadcast %24 : vector<1x128xf32> to vector<8x128xf32>
    %26 = arith.addf %22, %25 : vector<8x128xf32>
    %cst_20 = arith.constant 0.000000e+00 : f32
    %27 = vector.broadcast %cst_20 : f32 to vector<8x128xf32>
    %28 = arith.maximumf %26, %27 : vector<8x128xf32>
    %29 = arith.truncf %28 : vector<8x128xf32> to vector<8x128xbf16>
    %c0_21 = arith.constant 0 : index
    %c0_22 = arith.constant 0 : index
    %30 = vector.load %arg6[%c0_21, %c0_22] : memref<128x128xbf16, #tpu.memory_space<vmem>>, vector<128x128xbf16>
    %cst_23 = arith.constant dense<0.000000e+00> : vector<8x128xf32>
    %31 = tpu.matmul %29, %30, %cst_23 {dimension_numbers = #tpu.dot_dimension_numbers<[1], [0], [0], [1], [0, 0, 1, 1], [], []>} : vector<8x128xbf16>, vector<128x128xbf16>, vector<8x128xf32> -> vector<8x128xf32>
    %c0_24 = arith.constant 0 : index
    %c0_25 = arith.constant 0 : index
    %32 = vector.load %arg7[%c0_24, %c0_25] : memref<1x128xf32, #tpu.memory_space<vmem>>, vector<1x128xf32>
    %33 = vector.broadcast %32 : vector<1x128xf32> to vector<8x128xf32>
    %34 = arith.addf %31, %33 : vector<8x128xf32>
    %c0_26 = arith.constant 0 : index
    %c0_27 = arith.constant 0 : index
    %35 = vector.load %arg8[%c0_26, %c0_27] : memref<8x128xf32, #tpu.memory_space<vmem>>, vector<8x128xf32>
    tpu.vector_store %arg8[%c0_26, %c0_27], %34 {strides = array<i32>} : memref<8x128xf32, #tpu.memory_space<vmem>>, vector<8x128xf32>,
    return
  }
  func.func @transform_0(%arg0: i32) -> (i32, i32) {
    %c0_i32 = arith.constant 0 : i32
    %c0_i32_0 = arith.constant 0 : i32
    return %arg0, %c0_i32 : i32, i32
  }
  func.func @transform_1(%arg0: i32) -> (i32, i32) {
    %c0_i32 = arith.constant 0 : i32
    %c0_i32_0 = arith.constant 0 : i32
    %c0_i32_1 = arith.constant 0 : i32
    return %c0_i32, %c0_i32_0 : i32, i32
  }
  func.func @transform_2(%arg0: i32) -> (i32, i32) {
    %c0_i32 = arith.constant 0 : i32
    %c0_i32_0 = arith.constant 0 : i32
    %c0_i32_1 = arith.constant 0 : i32
    return %c0_i32, %c0_i32_0 : i32, i32
  }
  func.func @transform_3(%arg0: i32) -> (i32, i32, i32) {
    %c0_i32 = arith.constant 0 : i32
    %c0_i32_0 = arith.constant 0 : i32
    %c0_i32_1 = arith.constant 0 : i32
    %c0_i32_2 = arith.constant 0 : i32
    return %c0_i32, %c0_i32_0, %c0_i32_1 : i32, i32, i32
  }
  func.func @transform_4(%arg0: i32) -> (i32, i32, i32) {
    %c0_i32 = arith.constant 0 : i32
    %c0_i32_0 = arith.constant 0 : i32
    %c0_i32_1 = arith.constant 0 : i32
    %c0_i32_2 = arith.constant 0 : i32
    return %c0_i32, %c0_i32_0, %c0_i32_1 : i32, i32, i32
  }
  func.func @transform_5(%arg0: i32) -> (i32, i32) {
    %c0_i32 = arith.constant 0 : i32
    %c0_i32_0 = arith.constant 0 : i32
    %c0_i32_1 = arith.constant 0 : i32
    return %c0_i32, %c0_i32_0 : i32, i32
  }
  func.func @transform_6(%arg0: i32) -> (i32, i32) {
    %c0_i32 = arith.constant 0 : i32
    %c0_i32_0 = arith.constant 0 : i32
    %c0_i32_1 = arith.constant 0 : i32
    return %c0_i32, %c0_i32_0 : i32, i32
  }
  func.func @transform_7(%arg0: i32) -> (i32, i32) {
    %c0_i32 = arith.constant 0 : i32
    %c0_i32_0 = arith.constant 0 : i32
    return %arg0, %c0_i32 : i32, i32
  }
}

</mosaic_0001>

<bundles_post_ra>
// kernel: tpu_custom_call.1
= control target key start
LH: loop header
LB: loop body
LE: loop exit
PB: predicated region body
PF: predicated region fallthrough
CT: control target
= control target key end

     0   :  { %12 = vsyncpa [#allocation3], 0  ;;  %s1035_s0 = inlined_call_operand.hbm [shape: f32[8,128], index: 0, kind: input, shape index: {}]   ;;  %s1036_s1 = inlined_call_operand.hbm [shape: bf16[128,128], index: 1, kind: input, shape index: {}]   ;;  %s1037_s2 = inlined_call_operand.vmem [shape: f32[1,128], index: 2, kind: input, shape index: {}]   ;;  %s1038_s3 = inlined_call_operand.hbm [shape: bf16[2,128,128], index: 3, kind: input, shape index: {}]   ;;  %s1039_s4 = inlined_call_operand.vmem [shape: f32[2,1,128], index: 4, kind: input, shape index: {}]   ;;  %s1040_s5 = inlined_call_operand.hbm [shape: bf16[128,128], index: 5, kind: input, shape index: {}]   ;;  %s1041_s6 = inlined_call_operand.vmem [shape: f32[1,128], index: 6, kind: input, shape index: {}]   ;;  %s1042_s7 = inlined_call_operand.hbm [shape: f32[8,128], index: 7, kind: output, shape index: {}]  }
   0x1   :  { %13 = vsyncpa [#allocation6], 0 }
   0x2   :  { %14 = vsyncpa [#allocation9], 0 }
   0x3   :  { %15 = vsyncpa [#allocation4], 0  ;;  %s865_s24 = smov [#allocation5]   ;;  %s747_s28 = scalar_lea.hbm %s1036_s1, 1024 }
   0x4   :  { %s31_s25 = sshll.u32 %s865_s24, 4  ;;  %p748_p0 = scmp.ne.s32.totalorder %s1036_s1, %s747_s28  ;;  %s32_s25 = int_to_ptr.vmem [resolvable:$true] %s31_s25 }
   0x5   :  { %p751_p1 = scmp.lt.u32.totalorder %s747_s28, %s1036_s1 }
   0x7   :  { %p753_p2 = pnand %p751_p1, %p748_p0 }
   0x9   :  { %756 = shalt.err (!%p753_p2)
}
   0xa   :  { %s757_s10 = scalar_lea.vmem %s32_s25, 1024  ;;  %p762_p4 = scmp.lt.s32.totalorder %s32_s25, %s32_s25 }
   0xb   :  { %p758_p3 = scmp.ne.s32.totalorder %s32_s25, %s757_s10  ;;  %p763_p5 = scmp.lt.s32.totalorder %s757_s10, %s757_s10 }
   0xd   :  { %p764_p6 = por %p763_p5, %p762_p4 }
   0xf   :  { %p765_p7 = pnand %p764_p6, %p758_p3 }
  0x11   :  { %768 = shalt.err (!%p765_p7)
}
  0x12   :  { %s866_s11 = smov 64   ;;  %s867_s12 = smov 4  }
  0x13   :  { %37 = dma.hbm_to_vmem [thread:$0]  %s1036_s1, 1024, %s32_s25, [#allocation6], %s866_s11, %s866_s11, %s867_s12  }
  0x14   :  { %s868_s15 = smov [#allocation2]   ;;  %s869_s17 = smov [#allocation7]  }
  0x15   :  { %s22_s16 = sshll.u32 %s868_s15, 4  ;;  %s45_s18 = sshll.u32 %s869_s17, 4  ;;  %s23_s16 = int_to_ptr.vmem [resolvable:$true] %s22_s16  ;;  %s46_s18 = int_to_ptr.vmem [resolvable:$true] %s45_s18 }
  0x16   :  { %s769_s21 = scalar_lea.hbm %s1035_s0, 128 }
  0x17   :  { %p770_p8 = scmp.ne.s32.totalorder %s1035_s0, %s769_s21  ;;  %p773_p9 = scmp.lt.u32.totalorder %s769_s21, %s1035_s0 }
  0x19   :  { %p775_p10 = pnand %p773_p9, %p770_p8 }
  0x1b   :  { %778 = shalt.err (!%p775_p10)
}
  0x1c   :  { %s779_s1 = scalar_lea.vmem %s23_s16, 128  ;;  %p784_p12 = scmp.lt.s32.totalorder %s23_s16, %s23_s16 }
  0x1d   :  { %p780_p11 = scmp.ne.s32.totalorder %s23_s16, %s779_s1  ;;  %p785_p13 = scmp.lt.s32.totalorder %s779_s1, %s779_s1 }
  0x1f   :  { %p786_p0 = por %p785_p13, %p784_p12 }
  0x21   :  { %p787_p1 = pnand %p786_p0, %p780_p11 }
  0x23   :  { %790 = shalt.err (!%p787_p1)
}
  0x24   :  { %25 = dma.hbm_to_vmem [thread:$0]  %s1035_s0, 128, %s23_s16, [#allocation3]  }
  0x25   :  { %s791_s30 = scalar_lea.hbm %s1038_s3, 2048 }
  0x26   :  { %p792_p2 = scmp.ne.s32.totalorder %s1038_s3, %s791_s30  ;;  %p795_p3 = scmp.lt.u32.totalorder %s791_s30, %s1038_s3 }
  0x28   :  { %p797_p4 = pnand %p795_p3, %p792_p2 }
  0x2a   :  { %800 = shalt.err (!%p797_p4)
}
  0x2b   :  { %s801_s14 = scalar_lea.vmem %s46_s18, 2048  ;;  %p806_p6 = scmp.lt.s32.totalorder %s46_s18, %s46_s18 }
  0x2c   :  { %p802_p5 = scmp.ne.s32.totalorder %s46_s18, %s801_s14  ;;  %p807_p7 = scmp.lt.s32.totalorder %s801_s14, %s801_s14 }
  0x2e   :  { %p808_p8 = por %p807_p7, %p806_p6 }
  0x30   :  { %p809_p9 = pnand %p808_p8, %p802_p5 }
  0x32   :  { %812 = shalt.err (!%p809_p9)
}
  0x33   :  { %51 = dma.hbm_to_vmem [thread:$0]  %s1038_s3, 2048, %s46_s18, [#allocation6], %s866_s11, %s866_s11, %s867_s12  }
  0x34   :  { %s870_s16 = smov [#allocation8]   ;;  %s813_s21 = scalar_lea.hbm %s1040_s5, 1024 }
  0x35   :  { %s59_s17 = sshll.u32 %s870_s16, 4  ;;  %p814_p10 = scmp.ne.s32.totalorder %s1040_s5, %s813_s21  ;;  %s60_s17 = int_to_ptr.vmem [resolvable:$true] %s59_s17 }
  0x36   :  { %p817_p11 = scmp.lt.u32.totalorder %s813_s21, %s1040_s5 }
  0x38   :  { %p819_p12 = pnand %p817_p11, %p814_p10 }
  0x3a   :  { %822 = shalt.err (!%p819_p12)
}
  0x3b   :  { %s823_s1 = scalar_lea.vmem %s60_s17, 1024  ;;  %p828_p0 = scmp.lt.s32.totalorder %s60_s17, %s60_s17 }
  0x3c   :  { %p824_p13 = scmp.ne.s32.totalorder %s60_s17, %s823_s1  ;;  %p829_p1 = scmp.lt.s32.totalorder %s823_s1, %s823_s1 }
  0x3e   :  { %p830_p2 = por %p829_p1, %p828_p0 }
  0x40   :  { %p831_p3 = pnand %p830_p2, %p824_p13 }
  0x42   :  { %834 = shalt.err (!%p831_p3)
}
  0x43   :  { %65 = dma.hbm_to_vmem [thread:$0]  %s1040_s5, 1024, %s60_s17, [#allocation9], %s866_s11, %s866_s11, %s867_s12  }
  0x44   :  { %857 = dma.done.wait [#allocation3], 128  }
  0x45   :  { %858 = vsyncadd [#allocation3], 4294967168 }
  0x46   :  { %859 = dma.done.wait [#allocation6], 3072  }
  0x47   :  { %860 = vsyncadd [#allocation6], 4294964224 }
  0x48   :  { %861 = dma.done.wait [#allocation9], 1024  }
  0x49   :  { %862 = vsyncadd [#allocation9], 4294966272  ;;  %v871_v0 = vmov 0.0   ;;  %vm872_vm0 = vmmov 0   ;;  %v715_v1 = vld [vmem:[#allocation5] sm:$0xff]   ;;  %v716_v2 = vld [vmem:[#allocation5 + $0x8] sm:$0xff]  }
  0x4a   :  { %626 = vmatprep.subr.bf16.mxu0 %v871_v0  ;;  %642 = vmatprep.mubr.msk.bf16.mxu0 %vm872_vm0, %v871_v0  ;;  %v717_v3 = vld [vmem:[#allocation5 + $0x10] sm:$0xff]   ;;  %v723_v4 = vld [vmem:[#allocation7] sm:$0xff]   ;;  %v718_v5 = vld [vmem:[#allocation5 + $0x18] sm:$0xff]   ;;  %s873_s30 = smov [#allocation10]  }
  0x4b   :  { %646 = vmatprep.subr.bf16.mxu1 %v871_v0  ;;  %662 = vmatprep.mubr.msk.bf16.mxu1 %vm872_vm0, %v871_v0  ;;  %v724_v6 = vld [vmem:[#allocation7 + $0x8] sm:$0xff]   ;;  %v719_v7 = vld [vmem:[#allocation5 + $0x20] sm:$0xff]   ;;  %v725_v8 = vld [vmem:[#allocation7 + $0x10] sm:$0xff]   ;;  %s542_s8 = sshll.u32 %s873_s30, 4  ;;  %s543_s8 = int_to_ptr.vmem [resolvable:$true] %s542_s8 }
  0x4c   :  { %627 = vmatpush3.bf16.msra.mxu0 %v715_v1  ;;  %647 = vmatpush3.bf16.msra.mxu1 %v723_v4  ;;  %v720_v9 = vld [vmem:[#allocation5 + $0x28] sm:$0xff]   ;;  %v726_v10 = vld [vmem:[#allocation7 + $0x18] sm:$0xff]   ;;  %v721_v11 = vld [vmem:[#allocation5 + $0x30] sm:$0xff]   ;;  %p840_p5 = scmp.lt.s32.totalorder %s543_s8, %s543_s8 }
  0x4d   :  { %628 = vmatprep.subr.bf16.mxu0 %v871_v0  ;;  %648 = vmatprep.subr.bf16.mxu1 %v871_v0  ;;  %v727_v12 = vld [vmem:[#allocation7 + $0x20] sm:$0xff]   ;;  %v722_v13 = vld [vmem:[#allocation5 + $0x38] sm:$0xff]   ;;  %v728_v15 = vld [vmem:[#allocation7 + $0x28] sm:$0xff]  }
  0x4e   :  { %v81_v14 = vld [vmem:[#allocation2] sm:$0xff]  ;;  %v729_v17 = vld [vmem:[#allocation7 + $0x30] sm:$0xff]   ;;  %v731_v19 = vld [vmem:[#allocation7 + $0x40] sm:$0xff]  }
  0x4f   :  { %v82_v16 = vpack.c.bf16 %v81_v14, %v81_v14  ;;  %v730_v18 = vld [vmem:[#allocation7 + $0x38] sm:$0xff]   ;;  %v732_v20 = vld [vmem:[#allocation7 + $0x48] sm:$0xff]   ;;  %v733_v21 = vld [vmem:[#allocation7 + $0x50] sm:$0xff]  }
  0x50   :  { %629 = vmatpush3.bf16.msra.mxu0 %v716_v2  ;;  %649 = vmatpush3.bf16.msra.mxu1 %v724_v6  ;;  %v734_v22 = vld [vmem:[#allocation7 + $0x58] sm:$0xff]   ;;  %v735_v23 = vld [vmem:[#allocation7 + $0x60] sm:$0xff]   ;;  %v736_v24 = vld [vmem:[#allocation7 + $0x68] sm:$0xff]  }
  0x51   :  { %630 = vmatprep.subr.bf16.mxu0 %v871_v0  ;;  %650 = vmatprep.subr.bf16.mxu1 %v871_v0  ;;  %v553_v25 = vld [vmem:[%s1037_s2] ss:$0 sm:$0xff]  ;;  %v737_v33 = vld [vmem:[#allocation7 + $0x70] sm:$0xff]   ;;  %v739_v35 = vld [vmem:[#allocation8] sm:$0xff]  }
  0x52   :  { %v738_v34 = vld [vmem:[#allocation7 + $0x78] sm:$0xff]   ;;  %v740_v36 = vld [vmem:[#allocation8 + $0x8] sm:$0xff]   ;;  %v741_v37 = vld [vmem:[#allocation8 + $0x10] sm:$0xff]  }
  0x53   :  { %v742_v38 = vld [vmem:[#allocation8 + $0x18] sm:$0xff]   ;;  %v743_v39 = vld [vmem:[#allocation8 + $0x20] sm:$0xff]   ;;  %v744_v40 = vld [vmem:[#allocation8 + $0x28] sm:$0xff]  }
  0x54   :  { %631 = vmatpush3.bf16.msra.mxu0 %v717_v3  ;;  %651 = vmatpush3.bf16.msra.mxu1 %v725_v8  ;;  %v562_v41 = vld [vmem:[%s1039_s4] ss:$0 sm:$0xff]  ;;  %v745_v49 = vld [vmem:[#allocation8 + $0x30] sm:$0xff]   ;;  %v572_v51 = vld [vmem:[%s1039_s4 + $0x1] ss:$0 sm:$0xff]  ;;  %s835_s4 = scalar_lea.vmem %s543_s8, 128 }
  0x55   :  { %632 = vmatprep.subr.bf16.mxu0 %v871_v0  ;;  %652 = vmatprep.subr.bf16.mxu1 %v871_v0  ;;  %v746_v50 = vld [vmem:[#allocation8 + $0x38] sm:$0xff]   ;;  %p836_p4 = scmp.ne.s32.totalorder %s543_s8, %s835_s4  ;;  %p841_p6 = scmp.lt.s32.totalorder %s835_s4, %s835_s4 }
  0x56   :  { %v581_v59 = vld [vmem:[%s1041_s6] ss:$0 sm:$0xff] }
  0x57   :  { %p842_p7 = por %p841_p6, %p840_p5 }
  0x58   :  { %633 = vmatpush3.bf16.msra.mxu0 %v718_v5  ;;  %653 = vmatpush3.bf16.msra.mxu1 %v726_v10 }
  0x59   :  { %634 = vmatprep.subr.bf16.mxu0 %v871_v0  ;;  %654 = vmatprep.subr.bf16.mxu1 %v871_v0  ;;  %p843_p8 = pnand %p842_p7, %p836_p4 }
  0x5c   :  { %635 = vmatpush3.bf16.msra.mxu0 %v719_v7  ;;  %655 = vmatpush3.bf16.msra.mxu1 %v727_v12 }
  0x5d   :  { %636 = vmatprep.subr.bf16.mxu0 %v871_v0  ;;  %656 = vmatprep.subr.bf16.mxu1 %v871_v0 }
  0x60   :  { %637 = vmatpush3.bf16.msra.mxu0 %v720_v9  ;;  %657 = vmatpush3.bf16.msra.mxu1 %v728_v15 }
  0x61   :  { %638 = vmatprep.subr.bf16.mxu0 %v871_v0  ;;  %658 = vmatprep.subr.bf16.mxu1 %v871_v0 }
  0x64   :  { %639 = vmatpush3.bf16.msra.mxu0 %v721_v11  ;;  %659 = vmatpush3.bf16.msra.mxu1 %v729_v17 }
  0x65   :  { %640 = vmatprep.subr.bf16.mxu0 %v871_v0  ;;  %660 = vmatprep.subr.bf16.mxu1 %v871_v0 }
  0x68   :  { %641 = vmatpush3.bf16.msra.mxu0 %v722_v13  ;;  %661 = vmatpush3.bf16.msra.mxu1 %v730_v18 }
  0x69   :  { %666 = vmatprep.subr.bf16.mxu0 %v871_v0  ;;  %686 = vmatprep.subr.bf16.mxu1 %v871_v0 }
  0x6b   :  { %643 = vmatmul.mubr.bf16.vlgmr.msra.gmra.mrb[0].mxu0 %v82_v16 }
  0x6c   :  { %682 = vmatprep.mubr.msk.bf16.mxu0 %vm872_vm0, %v871_v0  ;;  %667 = vmatpush3.bf16.msra.mxu0 %v731_v19 }
  0x6d   :  { %668 = vmatprep.subr.bf16.mxu0 %v871_v0 }
  0x70   :  { %669 = vmatpush3.bf16.msra.mxu0 %v732_v20 }
  0x71   :  { %670 = vmatprep.subr.bf16.mxu0 %v871_v0 }
  0x74   :  { %671 = vmatpush3.bf16.msra.mxu0 %v733_v21 }
  0x75   :  { %672 = vmatprep.subr.bf16.mxu0 %v871_v0 }
  0x78   :  { %673 = vmatpush3.bf16.msra.mxu0 %v734_v22 }
  0x79   :  { %674 = vmatprep.subr.bf16.mxu0 %v871_v0 }
  0x7c   :  { %675 = vmatpush3.bf16.msra.mxu0 %v735_v23 }
  0x7d   :  { %676 = vmatprep.subr.bf16.mxu0 %v871_v0 }
  0x80   :  { %677 = vmatpush3.bf16.msra.mxu0 %v736_v24 }
  0x81   :  { %678 = vmatprep.subr.bf16.mxu0 %v871_v0 }
  0x84   :  { %679 = vmatpush3.bf16.msra.mxu0 %v737_v33 }
  0x85   :  { %680 = vmatprep.subr.bf16.mxu0 %v871_v0 }
  0x88   :  { %681 = vmatpush3.bf16.msra.mxu0 %v738_v34 }
 0x13e   :  { %v188_v26 = vpop.f32.mrb[0].mxu0 }
 0x13f   :  { %v189_v27 = vadd.f32 %v553_v25, %v188_v26  ;;  %v644_v28 = vpop.f32.mrb[1].mxu0 }
 0x140   :  { %v191_v29 = vpop.f32.mrb[2].mxu0 }
 0x141   :  { %v194_v30 = vmax.f32 %v189_v27, 0.0  ;;  %v645_v31 = vpop.f32.mrb[3].mxu0 }
 0x143   :  { %v195_v32 = vpack.c.bf16 %v194_v30, %v194_v30 }
 0x145   :  { %663 = vmatmul.mubr.bf16.vlgmr.msra.gmra.mrb[0].mxu1 %v195_v32 }
 0x146   :  { %702 = vmatprep.mubr.msk.bf16.mxu1 %vm872_vm0, %v871_v0  ;;  %687 = vmatpush3.bf16.msra.mxu1 %v739_v35 }
 0x147   :  { %688 = vmatprep.subr.bf16.mxu1 %v871_v0 }
 0x14a   :  { %689 = vmatpush3.bf16.msra.mxu1 %v740_v36 }
 0x14b   :  { %690 = vmatprep.subr.bf16.mxu1 %v871_v0 }
 0x14e   :  { %691 = vmatpush3.bf16.msra.mxu1 %v741_v37 }
 0x14f   :  { %692 = vmatprep.subr.bf16.mxu1 %v871_v0 }
 0x152   :  { %693 = vmatpush3.bf16.msra.mxu1 %v742_v38 }
 0x153   :  { %694 = vmatprep.subr.bf16.mxu1 %v871_v0 }
 0x156   :  { %695 = vmatpush3.bf16.msra.mxu1 %v743_v39 }
 0x157   :  { %696 = vmatprep.subr.bf16.mxu1 %v871_v0 }
 0x15a   :  { %697 = vmatpush3.bf16.msra.mxu1 %v744_v40 }
 0x15b   :  { %698 = vmatprep.subr.bf16.mxu1 %v871_v0 }
 0x15e   :  { %699 = vmatpush3.bf16.msra.mxu1 %v745_v49 }
 0x15f   :  { %700 = vmatprep.subr.bf16.mxu1 %v871_v0 }
 0x162   :  { %701 = vmatpush3.bf16.msra.mxu1 %v746_v50 }
 0x218   :  { %v301_v42 = vpop.f32.mrb[0].mxu1 }
 0x219   :  { %v302_v43 = vadd.f32 %v562_v41, %v301_v42  ;;  %v664_v44 = vpop.f32.mrb[1].mxu1 }
 0x21a   :  { %v304_v45 = vpop.f32.mrb[2].mxu1 }
 0x21b   :  { %v307_v46 = vmax.f32 %v302_v43, 0.0  ;;  %v665_v47 = vpop.f32.mrb[3].mxu1 }
 0x21d   :  { %v308_v48 = vpack.c.bf16 %v307_v46, %v307_v46 }
 0x21f   :  { %683 = vmatmul.mubr.bf16.vlgmr.msra.gmra.mrb[4].mxu0 %v308_v48 }
 0x2f2   :  { %v416_v52 = vpop.f32.mrb[4].mxu0 }
 0x2f3   :  { %v417_v53 = vadd.f32 %v572_v51, %v416_v52  ;;  %v684_v54 = vpop.f32.mrb[5].mxu0 }
 0x2f4   :  { %v419_v55 = vpop.f32.mrb[6].mxu0 }
 0x2f5   :  { %v422_v56 = vmax.f32 %v417_v53, 0.0  ;;  %v685_v57 = vpop.f32.mrb[7].mxu0 }
 0x2f7   :  { %v423_v58 = vpack.c.bf16 %v422_v56, %v422_v56 }
 0x2f9   :  { %703 = vmatmul.mubr.bf16.vlgmr.msra.gmra.mrb[4].mxu1 %v423_v58 }
 0x3cc   :  { %v529_v60 = vpop.f32.mrb[4].mxu1 }
 0x3cd   :  { %v530_v61 = vadd.f32 %v581_v59, %v529_v60  ;;  %v704_v62 = vpop.f32.mrb[5].mxu1 }
 0x3ce   :  { %v532_v63 = vpop.f32.mrb[6].mxu1 }
 0x3cf   :  { %535 = vst [vmem:[#allocation10] sm:$0xff] %v530_v61  ;;  %v705_v0 = vpop.f32.mrb[7].mxu1 }
 0x3d0   :  { %846 = shalt.err (!%p843_p8)
}
 0x3d1   :  { %s847_s6 = scalar_lea.hbm %s1042_s7, 128 }
 0x3d2   :  { %p848_p9 = scmp.ne.s32.totalorder %s1042_s7, %s847_s6  ;;  %p851_p10 = scmp.lt.u32.totalorder %s847_s6, %s1042_s7 }
 0x3d4   :  { %p853_p11 = pnand %p851_p10, %p848_p9 }
 0x3d6   :  { %856 = shalt.err (!%p853_p11)
}
 0x3d7   :  { %545 = dma.vmem_to_hbm [thread:$0]  %s543_s8, 128, %s1042_s7, [#allocation4]  }
 0x3d8   :  { %863 = dma.done.wait [#allocation4], 128  }
 0x3d9   :  { %864 = vsyncadd [#allocation4], 4294967168 }
 0x3da   :  { %549 = vsyncpa [#allocation3], 1 }
 0x3db   :  { %550 = vsyncpa [#allocation6], 1 }
 0x3dc   :  { %551 = vsyncpa [#allocation9], 1 }
 0x3dd   :  { %552 = vsyncpa [#allocation4], 1 }

// kernel: tpu_custom_call.1
= control target key start
LH: loop header
LB: loop body
LE: loop exit
PB: predicated region body
PF: predicated region fallthrough
CT: control target
= control target key end

     0   :  { %12 = vsyncpa [#allocation3], 0  ;;  %s1035_s0 = inlined_call_operand.hbm [shape: f32[8,128], index: 0, kind: input, shape index: {}]   ;;  %s1036_s1 = inlined_call_operand.hbm [shape: bf16[128,128], index: 1, kind: input, shape index: {}]   ;;  %s1037_s2 = inlined_call_operand.vmem [shape: f32[1,128], index: 2, kind: input, shape index: {}]   ;;  %s1038_s3 = inlined_call_operand.hbm [shape: bf16[2,128,128], index: 3, kind: input, shape index: {}]   ;;  %s1039_s4 = inlined_call_operand.vmem [shape: f32[2,1,128], index: 4, kind: input, shape index: {}]   ;;  %s1040_s5 = inlined_call_operand.hbm [shape: bf16[128,128], index: 5, kind: input, shape index: {}]   ;;  %s1041_s6 = inlined_call_operand.vmem [shape: f32[1,128], index: 6, kind: input, shape index: {}]   ;;  %s1042_s7 = inlined_call_operand.hbm [shape: f32[8,128], index: 7, kind: output, shape index: {}]  }
   0x1   :  { %13 = vsyncpa [#allocation6], 0 }
   0x2   :  { %14 = vsyncpa [#allocation9], 0 }
   0x3   :  { %15 = vsyncpa [#allocation4], 0  ;;  %s865_s24 = smov [#allocation5]   ;;  %s747_s28 = scalar_lea.hbm %s1036_s1, 1024 }
   0x4   :  { %s31_s25 = sshll.u32 %s865_s24, 4  ;;  %p748_p0 = scmp.ne.s32.totalorder %s1036_s1, %s747_s28  ;;  %s32_s25 = int_to_ptr.vmem [resolvable:$true] %s31_s25 }
   0x5   :  { %p751_p1 = scmp.lt.u32.totalorder %s747_s28, %s1036_s1 }
   0x7   :  { %p753_p2 = pnand %p751_p1, %p748_p0 }
   0x9   :  { %756 = shalt.err (!%p753_p2)
}
   0xa   :  { %s757_s10 = scalar_lea.vmem %s32_s25, 1024  ;;  %p762_p4 = scmp.lt.s32.totalorder %s32_s25, %s32_s25 }
   0xb   :  { %p758_p3 = scmp.ne.s32.totalorder %s32_s25, %s757_s10  ;;  %p763_p5 = scmp.lt.s32.totalorder %s757_s10, %s757_s10 }
   0xd   :  { %p764_p6 = por %p763_p5, %p762_p4 }
   0xf   :  { %p765_p7 = pnand %p764_p6, %p758_p3 }
  0x11   :  { %768 = shalt.err (!%p765_p7)
}
  0x12   :  { %s866_s11 = smov 64   ;;  %s867_s12 = smov 4  }
  0x13   :  { %37 = dma.hbm_to_vmem [thread:$0]  %s1036_s1, 1024, %s32_s25, [#allocation6], %s866_s11, %s866_s11, %s867_s12  }
  0x14   :  { %s868_s15 = smov [#allocation2]   ;;  %s869_s17 = smov [#allocation7]  }
  0x15   :  { %s22_s16 = sshll.u32 %s868_s15, 4  ;;  %s45_s18 = sshll.u32 %s869_s17, 4  ;;  %s23_s16 = int_to_ptr.vmem [resolvable:$true] %s22_s16  ;;  %s46_s18 = int_to_ptr.vmem [resolvable:$true] %s45_s18 }
  0x16   :  { %s769_s21 = scalar_lea.hbm %s1035_s0, 128 }
  0x17   :  { %p770_p8 = scmp.ne.s32.totalorder %s1035_s0, %s769_s21  ;;  %p773_p9 = scmp.lt.u32.totalorder %s769_s21, %s1035_s0 }
  0x19   :  { %p775_p10 = pnand %p773_p9, %p770_p8 }
  0x1b   :  { %778 = shalt.err (!%p775_p10)
}
  0x1c   :  { %s779_s1 = scalar_lea.vmem %s23_s16, 128  ;;  %p784_p12 = scmp.lt.s32.totalorder %s23_s16, %s23_s16 }
  0x1d   :  { %p780_p11 = scmp.ne.s32.totalorder %s23_s16, %s779_s1  ;;  %p785_p13 = scmp.lt.s32.totalorder %s779_s1, %s779_s1 }
  0x1f   :  { %p786_p0 = por %p785_p13, %p784_p12 }
  0x21   :  { %p787_p1 = pnand %p786_p0, %p780_p11 }
  0x23   :  { %790 = shalt.err (!%p787_p1)
}
  0x24   :  { %25 = dma.hbm_to_vmem [thread:$0]  %s1035_s0, 128, %s23_s16, [#allocation3]  }
  0x25   :  { %s791_s30 = scalar_lea.hbm %s1038_s3, 2048 }
  0x26   :  { %p792_p2 = scmp.ne.s32.totalorder %s1038_s3, %s791_s30  ;;  %p795_p3 = scmp.lt.u32.totalorder %s791_s30, %s1038_s3 }
  0x28   :  { %p797_p4 = pnand %p795_p3, %p792_p2 }
  0x2a   :  { %800 = shalt.err (!%p797_p4)
}
  0x2b   :  { %s801_s14 = scalar_lea.vmem %s46_s18, 2048  ;;  %p806_p6 = scmp.lt.s32.totalorder %s46_s18, %s46_s18 }
  0x2c   :  { %p802_p5 = scmp.ne.s32.totalorder %s46_s18, %s801_s14  ;;  %p807_p7 = scmp.lt.s32.totalorder %s801_s14, %s801_s14 }
  0x2e   :  { %p808_p8 = por %p807_p7, %p806_p6 }
  0x30   :  { %p809_p9 = pnand %p808_p8, %p802_p5 }
  0x32   :  { %812 = shalt.err (!%p809_p9)
}
  0x33   :  { %51 = dma.hbm_to_vmem [thread:$0]  %s1038_s3, 2048, %s46_s18, [#allocation6], %s866_s11, %s866_s11, %s867_s12  }
  0x34   :  { %s870_s16 = smov [#allocation8]   ;;  %s813_s21 = scalar_lea.hbm %s1040_s5, 1024 }
  0x35   :  { %s59_s17 = sshll.u32 %s870_s16, 4  ;;  %p814_p10 = scmp.ne.s32.totalorder %s1040_s5, %s813_s21  ;;  %s60_s17 = int_to_ptr.vmem [resolvable:$true] %s59_s17 }
  0x36   :  { %p817_p11 = scmp.lt.u32.totalorder %s813_s21, %s1040_s5 }
  0x38   :  { %p819_p12 = pnand %p817_p11, %p814_p10 }
  0x3a   :  { %822 = shalt.err (!%p819_p12)
}
  0x3b   :  { %s823_s1 = scalar_lea.vmem %s60_s17, 1024  ;;  %p828_p0 = scmp.lt.s32.totalorder %s60_s17, %s60_s17 }
  0x3c   :  { %p824_p13 = scmp.ne.s32.totalorder %s60_s17, %s823_s1  ;;  %p829_p1 = scmp.lt.s32.totalorder %s823_s1, %s823_s1 }
  0x3e   :  { %p830_p2 = por %p829_p1, %p828_p0 }
  0x40   :  { %p831_p3 = pnand %p830_p2, %p824_p13 }
  0x42   :  { %834 = shalt.err (!%p831_p3)
}
  0x43   :  { %65 = dma.hbm_to_vmem [thread:$0]  %s1040_s5, 1024, %s60_s17, [#allocation9], %s866_s11, %s866_s11, %s867_s12  }
  0x44   :  { %857 = dma.done.wait [#allocation3], 128  }
  0x45   :  { %858 = vsyncadd [#allocation3], 4294967168 }
  0x46   :  { %859 = dma.done.wait [#allocation6], 3072  }
  0x47   :  { %860 = vsyncadd [#allocation6], 4294964224 }
  0x48   :  { %861 = dma.done.wait [#allocation9], 1024  }
  0x49   :  { %862 = vsyncadd [#allocation9], 4294966272  ;;  %v871_v0 = vmov 0.0   ;;  %vm872_vm0 = vmmov 0   ;;  %v715_v1 = vld [vmem:[#allocation5] sm:$0xff]   ;;  %v716_v2 = vld [vmem:[#allocation5 + $0x8] sm:$0xff]  }
  0x4a   :  { %626 = vmatprep.subr.bf16.mxu0 %v871_v0  ;;  %642 = vmatprep.mubr.msk.bf16.mxu0 %vm872_vm0, %v871_v0  ;;  %v717_v3 = vld [vmem:[#allocation5 + $0x10] sm:$0xff]   ;;  %v723_v4 = vld [vmem:[#allocation7] sm:$0xff]   ;;  %v718_v5 = vld [vmem:[#allocation5 + $0x18] sm:$0xff]   ;;  %s873_s30 = smov [#allocation10]  }
  0x4b   :  { %646 = vmatprep.subr.bf16.mxu1 %v871_v0  ;;  %662 = vmatprep.mubr.msk.bf16.mxu1 %vm872_vm0, %v871_v0  ;;  %v724_v6 = vld [vmem:[#allocation7 + $0x8] sm:$0xff]   ;;  %v719_v7 = vld [vmem:[#allocation5 + $0x20] sm:$0xff]   ;;  %v725_v8 = vld [vmem:[#allocation7 + $0x10] sm:$0xff]   ;;  %s542_s8 = sshll.u32 %s873_s30, 4  ;;  %s543_s8 = int_to_ptr.vmem [resolvable:$true] %s542_s8 }
  0x4c   :  { %627 = vmatpush3.bf16.msra.mxu0 %v715_v1  ;;  %647 = vmatpush3.bf16.msra.mxu1 %v723_v4  ;;  %v720_v9 = vld [vmem:[#allocation5 + $0x28] sm:$0xff]   ;;  %v726_v10 = vld [vmem:[#allocation7 + $0x18] sm:$0xff]   ;;  %v721_v11 = vld [vmem:[#allocation5 + $0x30] sm:$0xff]   ;;  %p840_p5 = scmp.lt.s32.totalorder %s543_s8, %s543_s8 }
  0x4d   :  { %628 = vmatprep.subr.bf16.mxu0 %v871_v0  ;;  %648 = vmatprep.subr.bf16.mxu1 %v871_v0  ;;  %v727_v12 = vld [vmem:[#allocation7 + $0x20] sm:$0xff]   ;;  %v722_v13 = vld [vmem:[#allocation5 + $0x38] sm:$0xff]   ;;  %v728_v15 = vld [vmem:[#allocation7 + $0x28] sm:$0xff]  }
  0x4e   :  { %v81_v14 = vld [vmem:[#allocation2] sm:$0xff]  ;;  %v729_v17 = vld [vmem:[#allocation7 + $0x30] sm:$0xff]   ;;  %v731_v19 = vld [vmem:[#allocation7 + $0x40] sm:$0xff]  }
  0x4f   :  { %v82_v16 = vpack.c.bf16 %v81_v14, %v81_v14  ;;  %v730_v18 = vld [vmem:[#allocation7 + $0x38] sm:$0xff]   ;;  %v732_v20 = vld [vmem:[#allocation7 + $0x48] sm:$0xff]   ;;  %v733_v21 = vld [vmem:[#allocation7 + $0x50] sm:$0xff]  }
  0x50   :  { %629 = vmatpush3.bf16.msra.mxu0 %v716_v2  ;;  %649 = vmatpush3.bf16.msra.mxu1 %v724_v6  ;;  %v734_v22 = vld [vmem:[#allocation7 + $0x58] sm:$0xff]   ;;  %v735_v23 = vld [vmem:[#allocation7 + $0x60] sm:$0xff]   ;;  %v736_v24 = vld [vmem:[#allocation7 + $0x68] sm:$0xff]  }
  0x51   :  { %630 = vmatprep.subr.bf16.mxu0 %v871_v0  ;;  %650 = vmatprep.subr.bf16.mxu1 %v871_v0  ;;  %v553_v25 = vld [vmem:[%s1037_s2] ss:$0 sm:$0xff]  ;;  %v737_v33 = vld [vmem:[#allocation7 + $0x70] sm:$0xff]   ;;  %v739_v35 = vld [vmem:[#allocation8] sm:$0xff]  }
  0x52   :  { %v738_v34 = vld [vmem:[#allocation7 + $0x78] sm:$0xff]   ;;  %v740_v36 = vld [vmem:[#allocation8 + $0x8] sm:$0xff]   ;;  %v741_v37 = vld [vmem:[#allocation8 + $0x10] sm:$0xff]  }
  0x53   :  { %v742_v38 = vld [vmem:[#allocation8 + $0x18] sm:$0xff]   ;;  %v743_v39 = vld [vmem:[#allocation8 + $0x20] sm:$0xff]   ;;  %v744_v40 = vld [vmem:[#allocation8 + $0x28] sm:$0xff]  }
  0x54   :  { %631 = vmatpush3.bf16.msra.mxu0 %v717_v3  ;;  %651 = vmatpush3.bf16.msra.mxu1 %v725_v8  ;;  %v562_v41 = vld [vmem:[%s1039_s4] ss:$0 sm:$0xff]  ;;  %v745_v49 = vld [vmem:[#allocation8 + $0x30] sm:$0xff]   ;;  %v572_v51 = vld [vmem:[%s1039_s4 + $0x1] ss:$0 sm:$0xff]  ;;  %s835_s4 = scalar_lea.vmem %s543_s8, 128 }
  0x55   :  { %632 = vmatprep.subr.bf16.mxu0 %v871_v0  ;;  %652 = vmatprep.subr.bf16.mxu1 %v871_v0  ;;  %v746_v50 = vld [vmem:[#allocation8 + $0x38] sm:$0xff]   ;;  %p836_p4 = scmp.ne.s32.totalorder %s543_s8, %s835_s4  ;;  %p841_p6 = scmp.lt.s32.totalorder %s835_s4, %s835_s4 }
  0x56   :  { %v581_v59 = vld [vmem:[%s1041_s6] ss:$0 sm:$0xff] }
  0x57   :  { %p842_p7 = por %p841_p6, %p840_p5 }
  0x58   :  { %633 = vmatpush3.bf16.msra.mxu0 %v718_v5  ;;  %653 = vmatpush3.bf16.msra.mxu1 %v726_v10 }
  0x59   :  { %634 = vmatprep.subr.bf16.mxu0 %v871_v0  ;;  %654 = vmatprep.subr.bf16.mxu1 %v871_v0  ;;  %p843_p8 = pnand %p842_p7, %p836_p4 }
  0x5c   :  { %635 = vmatpush3.bf16.msra.mxu0 %v719_v7  ;;  %655 = vmatpush3.bf16.msra.mxu1 %v727_v12 }
  0x5d   :  { %636 = vmatprep.subr.bf16.mxu0 %v871_v0  ;;  %656 = vmatprep.subr.bf16.mxu1 %v871_v0 }
  0x60   :  { %637 = vmatpush3.bf16.msra.mxu0 %v720_v9  ;;  %657 = vmatpush3.bf16.msra.mxu1 %v728_v15 }
  0x61   :  { %638 = vmatprep.subr.bf16.mxu0 %v871_v0  ;;  %658 = vmatprep.subr.bf16.mxu1 %v871_v0 }
  0x64   :  { %639 = vmatpush3.bf16.msra.mxu0 %v721_v11  ;;  %659 = vmatpush3.bf16.msra.mxu1 %v729_v17 }
  0x65   :  { %640 = vmatprep.subr.bf16.mxu0 %v871_v0  ;;  %660 = vmatprep.subr.bf16.mxu1 %v871_v0 }
  0x68   :  { %641 = vmatpush3.bf16.msra.mxu0 %v722_v13  ;;  %661 = vmatpush3.bf16.msra.mxu1 %v730_v18 }
  0x69   :  { %666 = vmatprep.subr.bf16.mxu0 %v871_v0  ;;  %686 = vmatprep.subr.bf16.mxu1 %v871_v0 }
  0x6b   :  { %643 = vmatmul.mubr.bf16.vlgmr.msra.gmra.mrb[0].mxu0 %v82_v16 }
  0x6c   :  { %682 = vmatprep.mubr.msk.bf16.mxu0 %vm872_vm0, %v871_v0  ;;  %667 = vmatpush3.bf16.msra.mxu0 %v731_v19 }
  0x6d   :  { %668 = vmatprep.subr.bf16.mxu0 %v871_v0 }
  0x70   :  { %669 = vmatpush3.bf16.msra.mxu0 %v732_v20 }
  0x71   :  { %670 = vmatprep.subr.bf16.mxu0 %v871_v0 }
  0x74   :  { %671 = vmatpush3.bf16.msra.mxu0 %v733_v21 }
  0x75   :  { %672 = vmatprep.subr.bf16.mxu0 %v871_v0 }
  0x78   :  { %673 = vmatpush3.bf16.msra.mxu0 %v734_v22 }
  0x79   :  { %674 = vmatprep.subr.bf16.mxu0 %v871_v0 }
  0x7c   :  { %675 = vmatpush3.bf16.msra.mxu0 %v735_v23 }
  0x7d   :  { %676 = vmatprep.subr.bf16.mxu0 %v871_v0 }
  0x80   :  { %677 = vmatpush3.bf16.msra.mxu0 %v736_v24 }
  0x81   :  { %678 = vmatprep.subr.bf16.mxu0 %v871_v0 }
  0x84   :  { %679 = vmatpush3.bf16.msra.mxu0 %v737_v33 }
  0x85   :  { %680 = vmatprep.subr.bf16.mxu0 %v871_v0 }
  0x88   :  { %681 = vmatpush3.bf16.msra.mxu0 %v738_v34 }
 0x13e   :  { %v188_v26 = vpop.f32.mrb[0].mxu0 }
 0x13f   :  { %v189_v27 = vadd.f32 %v553_v25, %v188_v26  ;;  %v644_v28 = vpop.f32.mrb[1].mxu0 }
 0x140   :  { %v191_v29 = vpop.f32.mrb[2].mxu0 }
 0x141   :  { %v194_v30 = vmax.f32 %v189_v27, 0.0  ;;  %v645_v31 = vpop.f32.mrb[3].mxu0 }
 0x143   :  { %v195_v32 = vpack.c.bf16 %v194_v30, %v194_v30 }
 0x145   :  { %663 = vmatmul.mubr.bf16.vlgmr.msra.gmra.mrb[0].mxu1 %v195_v32 }
 0x146   :  { %702 = vmatprep.mubr.msk.bf16.mxu1 %vm872_vm0, %v871_v0  ;;  %687 = vmatpush3.bf16.msra.mxu1 %v739_v35 }
 0x147   :  { %688 = vmatprep.subr.bf16.mxu1 %v871_v0 }
 0x14a   :  { %689 = vmatpush3.bf16.msra.mxu1 %v740_v36 }
 0x14b   :  { %690 = vmatprep.subr.bf16.mxu1 %v871_v0 }
 0x14e   :  { %691 = vmatpush3.bf16.msra.mxu1 %v741_v37 }
 0x14f   :  { %692 = vmatprep.subr.bf16.mxu1 %v871_v0 }
 0x152   :  { %693 = vmatpush3.bf16.msra.mxu1 %v742_v38 }
 0x153   :  { %694 = vmatprep.subr.bf16.mxu1 %v871_v0 }
 0x156   :  { %695 = vmatpush3.bf16.msra.mxu1 %v743_v39 }
 0x157   :  { %696 = vmatprep.subr.bf16.mxu1 %v871_v0 }
 0x15a   :  { %697 = vmatpush3.bf16.msra.mxu1 %v744_v40 }
 0x15b   :  { %698 = vmatprep.subr.bf16.mxu1 %v871_v0 }
 0x15e   :  { %699 = vmatpush3.bf16.msra.mxu1 %v745_v49 }
 0x15f   :  { %700 = vmatprep.subr.bf16.mxu1 %v871_v0 }
 0x162   :  { %701 = vmatpush3.bf16.msra.mxu1 %v746_v50 }
 0x218   :  { %v301_v42 = vpop.f32.mrb[0].mxu1 }
 0x219   :  { %v302_v43 = vadd.f32 %v562_v41, %v301_v42  ;;  %v664_v44 = vpop.f32.mrb[1].mxu1 }
 0x21a   :  { %v304_v45 = vpop.f32.mrb[2].mxu1 }
 0x21b   :  { %v307_v46 = vmax.f32 %v302_v43, 0.0  ;;  %v665_v47 = vpop.f32.mrb[3].mxu1 }
 0x21d   :  { %v308_v48 = vpack.c.bf16 %v307_v46, %v307_v46 }
 0x21f   :  { %683 = vmatmul.mubr.bf16.vlgmr.msra.gmra.mrb[4].mxu0 %v308_v48 }
 0x2f2   :  { %v416_v52 = vpop.f32.mrb[4].mxu0 }
 0x2f3   :  { %v417_v53 = vadd.f32 %v572_v51, %v416_v52  ;;  %v684_v54 = vpop.f32.mrb[5].mxu0 }
 0x2f4   :  { %v419_v55 = vpop.f32.mrb[6].mxu0 }
 0x2f5   :  { %v422_v56 = vmax.f32 %v417_v53, 0.0  ;;  %v685_v57 = vpop.f32.mrb[7].mxu0 }
 0x2f7   :  { %v423_v58 = vpack.c.bf16 %v422_v56, %v422_v56 }
 0x2f9   :  { %703 = vmatmul.mubr.bf16.vlgmr.msra.gmra.mrb[4].mxu1 %v423_v58 }
 0x3cc   :  { %v529_v60 = vpop.f32.mrb[4].mxu1 }
 0x3cd   :  { %v530_v61 = vadd.f32 %v581_v59, %v529_v60  ;;  %v704_v62 = vpop.f32.mrb[5].mxu1 }
 0x3ce   :  { %v532_v63 = vpop.f32.mrb[6].mxu1 }
 0x3cf   :  { %535 = vst [vmem:[#allocation10] sm:$0xff] %v530_v61  ;;  %v705_v0 = vpop.f32.mrb[7].mxu1 }
 0x3d0   :  { %846 = shalt.err (!%p843_p8)
}
 0x3d1   :  { %s847_s6 = scalar_lea.hbm %s1042_s7, 128 }
 0x3d2   :  { %p848_p9 = scmp.ne.s32.totalorder %s1042_s7, %s847_s6  ;;  %p851_p10 = scmp.lt.u32.totalorder %s847_s6, %s1042_s7 }
 0x3d4   :  { %p853_p11 = pnand %p851_p10, %p848_p9 }
 0x3d6   :  { %856 = shalt.err (!%p853_p11)
}
 0x3d7   :  { %545 = dma.vmem_to_hbm [thread:$0]  %s543_s8, 128, %s1042_s7, [#allocation4]  }
 0x3d8   :  { %863 = dma.done.wait [#allocation4], 128  }
 0x3d9   :  { %864 = vsyncadd [#allocation4], 4294967168 }
 0x3da   :  { %549 = vsyncpa [#allocation3], 1 }
 0x3db   :  { %550 = vsyncpa [#allocation6], 1 }
 0x3dc   :  { %551 = vsyncpa [#allocation9], 1 }
 0x3dd   :  { %552 = vsyncpa [#allocation4], 1 }

</bundles_post_ra>
